<compile_context>
chip_gen: v7x
topology: tpu7x:2x2x1
jax: 0.10.0
libtpu: 0.0.40
codegen_flags: <defaults>
</compile_context>

<pallas_src>
import jax
import jax.numpy as jnp
from jax.experimental import pallas as pl
from jax.experimental.pallas import tpu as pltpu

# ----------------------------- configuration --------------------------------
B = 2            # batch
C = 4            # channels (Downsample(channels=4))
H = W = 16       # spatial
K = 3            # conv kernel
STRIDE = 2
PAD = 1
HO = (H + 2 * PAD - K) // STRIDE + 1     # 8
WO = (W + 2 * PAD - K) // STRIDE + 1     # 8
S_OUT = HO * WO                          # 64 output positions per batch
KROWS = K * K * C + 1                    # 9*C tap rows + 1 ones row (bias)


# ----------------------------- Pallas kernel ---------------------------------
def downsample_conv_kernel(p_ref, w_ref, o_ref):
    """One batch element of the strided conv as a single MXU matmul.

    p_ref: (1, 9C+1, Ho*Wo)  im2col patches (last row = ones, carries the bias)
    w_ref: (C, 9C+1)         conv weight (last column = bias)
    o_ref: (1, C, Ho*Wo)
    """
    o_ref[0] = jnp.dot(w_ref[...], p_ref[0],
                       preferred_element_type=jnp.float32)


# ----------------------------- host-side glue --------------------------------
def _im2col_stride2(x):
    """(B, C, H, W) -> (B, 9*C + 1, Ho*Wo). Pad + static strided slices only."""
    xp = jnp.pad(x, ((0, 0), (0, 0), (PAD, PAD), (PAD, PAD)))
    taps = []
    for ky in range(K):
        for kx in range(K):
            taps.append(
                xp[:, :,
                   ky:ky + STRIDE * HO:STRIDE,
                   kx:kx + STRIDE * WO:STRIDE].reshape(B, C, S_OUT))
    taps.append(jnp.ones((B, 1, S_OUT), x.dtype))      # ones row -> bias
    return jnp.concatenate(taps, axis=1)               # (B, 9C+1, Ho*Wo)


@jax.jit
def downsample_forward(x, conv_w, conv_b):
    """Downsample.forward with use_conv=True, dims=2."""
    patches = _im2col_stride2(x)                                    # (B,9C+1,S)
    # weight laid out to match the (ky, kx, ci) patch-row ordering; bias folded
    # in as the last column so the kernel is a single matmul.
    w2 = jnp.transpose(conv_w, (0, 2, 3, 1)).reshape(C, K * K * C)  # (C, 9C)
    w2aug = jnp.concatenate([w2, conv_b.reshape(C, 1)], axis=1)     # (C, 9C+1)

    out_flat = pl.pallas_call(
        downsample_conv_kernel,
        out_shape=jax.ShapeDtypeStruct((B, C, S_OUT), jnp.float32),
        grid=(B,),
        in_specs=[
            pl.BlockSpec((1, KROWS, S_OUT), lambda b: (b, 0, 0)),
            pl.BlockSpec((C, KROWS), lambda b: (0, 0)),
        ],
        out_specs=pl.BlockSpec((1, C, S_OUT), lambda b: (b, 0, 0)),
        compiler_params=pltpu.CompilerParams(
            dimension_semantics=("parallel",)),
    )(patches, w2aug)

    return out_flat.reshape(B, C, HO, WO)


# ----------------------------- pure-JAX reference ------------------------------
def reference_forward(x, conv_w, conv_b):
    y = jax.lax.conv_general_dilated(
        x, conv_w,
        window_strides=(STRIDE, STRIDE),
        padding=((PAD, PAD), (PAD, PAD)),
        dimension_numbers=("NCHW", "OIHW", "NCHW"),
        precision=jax.lax.Precision.HIGHEST)
    return y + conv_b.reshape(1, C, 1, 1)


# ----------------------------- main --------------------------------------------
if __name__ == "__main__":
    key = jax.random.PRNGKey(0)
    kx, kw, kb = jax.random.split(key, 3)

    x = jax.random.normal(kx, (B, C, H, W), jnp.float32)
    conv_w = jax.random.normal(kw, (C, C, K, K), jnp.float32) * 0.1
    conv_b = jax.random.normal(kb, (C,), jnp.float32) * 0.1

    out = downsample_forward(x, conv_w, conv_b)
    out = jax.block_until_ready(out)

    ref = reference_forward(x, conv_w, conv_b)

    assert out.shape == (B, C, HO, WO), out.shape
    assert bool(jnp.all(jnp.isfinite(out)))
    assert jnp.allclose(out, ref, rtol=2e-3, atol=2e-3), (
        float(jnp.max(jnp.abs(out - ref))))

    print("KERNEL_OK")
</pallas_src>

<mosaic_0001>
module attributes {stable_mosaic.version = 11 : i64} {
  func.func @downsample_conv_kernel(%arg0: i32, %arg1: memref<1x37x64xf32, #tpu.memory_space<vmem>>, %arg2: memref<4x37xf32, #tpu.memory_space<vmem>>, %arg3: memref<1x4x64xf32, #tpu.memory_space<vmem>>) attributes {dimension_semantics = [#tpu.dimension_semantics<parallel>], iteration_bounds = array<i64: 2>, scalar_prefetch = 0 : i64, scratch_operands = 0 : i64, tpu.core_type = #tpu.core_type<tc>, window_params = [{transform_indices = @transform_0, window_bounds = array<i64: 1, 37, 64>}, {pipeline_mode = #tpu.pipeline_mode<synchronous>, transform_indices = @transform_1, window_bounds = array<i64: 4, 37>}, {transform_indices = @transform_2, window_bounds = array<i64: 1, 4, 64>}]} {
    %c0 = arith.constant 0 : index
    %c0_0 = arith.constant 0 : index
    %0 = vector.load %arg2[%c0, %c0_0] : memref<4x37xf32, #tpu.memory_space<vmem>>, vector<4x37xf32>
    %c0_1 = arith.constant 0 : index
    %c0_2 = arith.constant 0 : index
    %c0_3 = arith.constant 0 : index
    %1 = vector.load %arg1[%c0_1, %c0_2, %c0_3] : memref<1x37x64xf32, #tpu.memory_space<vmem>>, vector<1x37x64xf32>
    %2 = vector.shape_cast %1 : vector<1x37x64xf32> to vector<37x64xf32>
    %cst = arith.constant dense<0.000000e+00> : vector<4x64xf32>
    %3 = tpu.matmul %0, %2, %cst {dimension_numbers = #tpu.dot_dimension_numbers<[1], [0], [0], [1], [0, 0, 1, 1], [], []>} : vector<4x37xf32>, vector<37x64xf32>, vector<4x64xf32> -> vector<4x64xf32>
    %c0_4 = arith.constant 0 : index
    %c0_5 = arith.constant 0 : index
    %c0_6 = arith.constant 0 : index
    %4 = vector.load %arg3[%c0_4, %c0_5, %c0_6] : memref<1x4x64xf32, #tpu.memory_space<vmem>>, vector<1x4x64xf32>
    %5 = vector.shape_cast %4 : vector<1x4x64xf32> to vector<4x64xf32>
    %6 = vector.shape_cast %3 : vector<4x64xf32> to vector<1x4x64xf32>
    tpu.vector_store %arg3[%c0_4, %c0_5, %c0_6], %6 {strides = array<i32>} : memref<1x4x64xf32, #tpu.memory_space<vmem>>, vector<1x4x64xf32>,
    return
  }
  func.func @transform_0(%arg0: i32) -> (i32, i32, i32) {
    %c0_i32 = arith.constant 0 : i32
    %c0_i32_0 = arith.constant 0 : i32
    %c0_i32_1 = arith.constant 0 : i32
    return %arg0, %c0_i32, %c0_i32_0 : i32, i32, i32
  }
  func.func @transform_1(%arg0: i32) -> (i32, i32) {
    %c0_i32 = arith.constant 0 : i32
    %c0_i32_0 = arith.constant 0 : i32
    %c0_i32_1 = arith.constant 0 : i32
    return %c0_i32, %c0_i32_0 : i32, i32
  }
  func.func @transform_2(%arg0: i32) -> (i32, i32, i32) {
    %c0_i32 = arith.constant 0 : i32
    %c0_i32_0 = arith.constant 0 : i32
    %c0_i32_1 = arith.constant 0 : i32
    return %arg0, %c0_i32, %c0_i32_0 : i32, i32, i32
  }
}

</mosaic_0001>

<bundles_post_ra>
// kernel: downsample_forward.1
= control target key start
LH: loop header
LB: loop body
LE: loop exit
PB: predicated region body
PF: predicated region fallthrough
CT: control target
= control target key end

     0   :  { %s355_s9 = smov 0   ;;  %s375_s0 = inlined_call_operand.vmem [shape: f32[2,37,64], index: 0, kind: input, shape index: {}]   ;;  %s376_s1 = inlined_call_operand.vmem [shape: f32[4,37], index: 1, kind: input, shape index: {}]   ;;  %s377_s2 = inlined_call_operand.vmem [shape: f32[2,4,64], index: 2, kind: output, shape index: {}]  }
   0x1 LB: > { %s281_s10 = sadd.s32 4294967295, %s335_s9   ;;  %p285_p0 = scmp.ge.s32.totalorder %s335_s9, 1  ;;  %s335_s9 = sphi %s355_s9, %s12_s9  }
   0x2   : > { %p112_p1 = scmp.lt.s32.totalorder %s335_s9, 3 }
   0x4   : > { %p113_p2 = pnand %p285_p0, %p112_p1 }
   0x5   : > { %p133_p3 = scmp.lt.s32.totalorder (!%p113_p2), %s281_s10, 1  ;;  %v337_v0 = vmov (!%p113_p2), 0.0|0.0   ;;  %vm338_vm0 = vmmov (!%p113_p2), 0   ;;  %v339_v1 = vmov (!%p113_p2), 0.0   ;;  %vm152_vm1 = vcmask (!%p113_p2), 1044480  }
   0x6   : > { %116 = sbr.rel (%p113_p2) target bundleno = 242 (0xf2), region = 28  ;;  %311 = vmatprep.subr.bf16.mxu0 (!%p113_p2), %v337_v0  ;;  %308 = vmatprep.mubr.msk.f32.mxu0 (!%p113_p2), %vm338_vm0, %v339_v1  ;;  %v142_v9 = vld [vmem:[%s376_s1] sm:$0xf] (!%p113_p2)  ;;  %vm148_vm2 = vcmask (!%p113_p2), 302080   ;;  %vm226_vm3 = vcmask (!%p113_p2), 519168  }
   0xd   : > { %s379_s10 = smov (!%p133_p3, %s281_s10), 1 }
   0xe   : > { %s317_s11 = smul.u32 40, %s379_s10  ;;  %s287_s17 = sshll.u32 %s379_s10, 2 }
   0xf   : > { %s141_s20 = scalar_lea.vmem %s377_s2, %s287_s17 }
  0x10   : > { %s137_s14 = scalar_lea.vmem %s375_s0, %s317_s11 }
  0x11   : > { %v143_v2 = vld [vmem:[%s137_s14] sm:$0xff]  ;;  %v144_v3 = vld [vmem:[%s137_s14 + $0x8] sm:$0xff]  ;;  %v145_v4 = vld [vmem:[%s137_s14 + $0x10] sm:$0xff] }
  0x12   : > { %v312_v5 = vpack.c.bf16 %v144_v3, %v143_v2  ;;  %v146_v6 = vld [vmem:[%s137_s14 + $0x18] sm:$0xff]  ;;  %v147_v8 = vld [vmem:[%s137_s14 + $0x20] sm:$0x1f] }
  0x13   : > { %v315_v7 = vpack.c.bf16 %v146_v6, %v145_v4 }
  0x14   : > { %313 = vmatpush3.bf16.msra.mxu0 %v312_v5 }
  0x15   : > { %314 = vmatprep.subr.bf16.mxu0 %v337_v0 }
  0x18   : > { %316 = vmatpush3.bf16.msra.mxu0 %v315_v7 }
  0x19   : > { %306 = vmatprep.subr.mxu0 %v339_v1 }
  0x1c   : > { %307 = vmatpush3.msk.msra.mxu0 %vm152_vm1, %v147_v8 }
  0x1d   : > { %309 = vmatmul.mubr.msk.f32.vlgmr.msra.gmra.mrb[0].mxu0 %vm148_vm2, %v142_v9 }
  0xf0   : > { %v222_v10 = vpop.f32.mrb[0].mxu0 }
  0xf1   : > { %227 = vst.msk [vmem:[%s141_s20] sm:$0xf] %vm226_vm3, %v222_v10  ;;  %v310_v11 = vpop.f32.mrb[1].mxu0 }
  0xf2 PF: > { %s12_s9 = sadd.s32 1, %s335_s9  }
  0xf3   : > { %p9_p4 = scmp.ge.s32.totalorder %s12_s9, 4  }
  0xf5   :  { %11 = sbr.rel (!%p9_p4) target bundleno = 1 (0x1), region = 58 }

</bundles_post_ra>
